<compile_context>
chip_gen: v7x
topology: tpu7x:2x2x1
jax: 0.10.0
libtpu: 0.0.40
codegen_flags: <defaults>
</compile_context>

<pallas_src>
import jax
import jax.numpy as jnp
from jax.experimental import pallas as pl
from jax.experimental.pallas import tpu as pltpu

# ---- hyper-parameters (baked as compile-time constants) ------------------------------
TAU = 0.8
LAM = 0.5
PRELU_ALPHA = 0.25      # nn.PReLU default init
LEAKY_SLOPE = 0.2       # GAT-style LeakyReLU slope in the schema encoder
EPS = 1e-8

N_NODES = 16
FEATS_DIM = 64
HIDDEN_DIM = 32


def _elu(x):
    # safe ELU: exp only sees non-positive values
    return jnp.where(x > 0, x, jnp.exp(jnp.minimum(x, 0.0)) - 1.0)


def heco_kernel(x_ref, adj_ref, A_ref, pos_ref,
                wenc_ref, wproj_ref, vec_ref,
                loss_ref):
    f32 = jnp.float32
    N = x_ref.shape[0]

    x = x_ref[...]                                                     # (N, D)

    # packed small-parameter slab (8, H): static row views, zero runtime cost
    b_mp_in = vec_ref[0:1, :]     # b_fc @ W_mp   (pre-aggregation bias)
    b_mp_out = vec_ref[1:2, :]    # b_mp          (post-aggregation bias)
    b_sc = vec_ref[2:3, :]        # b_fc @ W_sc
    a_l = vec_ref[3:4, :]
    a_r = vec_ref[4:5, :]
    b_p1 = vec_ref[5:6, :]
    b_p2 = vec_ref[6:7, :]

    # ---------------- Mp_encoder: 1-layer GCN + PReLU (fc_list folded in) --------------
    s = jnp.dot(x, wenc_ref[0], preferred_element_type=f32) + b_mp_in  # (N, H)
    s = jnp.dot(adj_ref[...], s, preferred_element_type=f32) + b_mp_out
    z_mp = jnp.where(s > 0, s, PRELU_ALPHA * s)                        # (N, H)

    # ---------------- Sc_encoder: single-head GAT + ELU (fc_list folded in) ------------
    hs = jnp.dot(x, wenc_ref[1], preferred_element_type=f32) + b_sc    # (N, H)
    el = jnp.sum(hs * a_l, axis=1, keepdims=True)                      # (N, 1)
    er = pl.dot(a_r, hs, trans_b=True)                                 # (1, N) MXU trans_b
    scores = el + er                                                   # (N, N)
    scores = jnp.where(scores > 0, scores, LEAKY_SLOPE * scores)
    A = A_ref[...]
    masked = jnp.where(A > 0, scores, jnp.full_like(scores, -1e9))
    masked = masked - jnp.max(masked, axis=1, keepdims=True)
    ex = jnp.where(A > 0, jnp.exp(masked), jnp.zeros_like(masked))
    inv_den = pl.reciprocal(jnp.sum(ex, axis=1, keepdims=True) + EPS, approx=True)
    alpha = ex * inv_den
    z_sc = _elu(jnp.dot(alpha, hs, preferred_element_type=f32))        # (N, H)

    # ---------------- Contrast: shared projection head ---------------------------------
    def proj(z):
        p = jnp.dot(z, wproj_ref[0], preferred_element_type=f32) + b_p1
        p = _elu(p)
        return jnp.dot(p, wproj_ref[1], preferred_element_type=f32) + b_p2

    zp_mp = proj(z_mp)
    zp_sc = proj(z_sc)

    # cosine similarity / tau, exponentiated (rsqrt on EUP; +EPS guards zero rows)
    zn_mp = zp_mp * jax.lax.rsqrt(jnp.sum(zp_mp * zp_mp, axis=1, keepdims=True) + EPS)
    zn_sc = zp_sc * jax.lax.rsqrt(jnp.sum(zp_sc * zp_sc, axis=1, keepdims=True) + EPS)
    sim = jnp.exp(pl.dot(zn_mp, zn_sc, trans_b=True) * (1.0 / TAU))    # mp2sc, (N, N)

    pos = pos_ref[0]                                                   # (N, N)
    post = pos_ref[1]                                                  # pos^T, (N, N)

    # lori_mp: row-normalize sim, weight by pos, -log, mean
    inv_row = pl.reciprocal(jnp.sum(sim, axis=1, keepdims=True) + EPS, approx=True)
    num_mp = jnp.sum(sim * pos, axis=1, keepdims=True)                 # (N, 1)
    lori_mp = -jnp.sum(jnp.log(num_mp * inv_row), axis=0, keepdims=True) * (1.0 / N)

    # lori_sc: same on sim.T, done via column reductions (no in-kernel transpose)
    inv_col = pl.reciprocal(jnp.sum(sim, axis=0, keepdims=True) + EPS, approx=True)
    num_sc = jnp.sum(sim * post, axis=0, keepdims=True)                # (1, N)
    lori_sc = -jnp.sum(jnp.log(num_sc * inv_col), axis=1, keepdims=True) * (1.0 / N)

    loss = LAM * lori_mp + (1.0 - LAM) * lori_sc                       # (1, 1)
    # lane-dense output slab: unmasked vst, sliced to a scalar in the wrapper
    loss_ref[...] = jnp.broadcast_to(loss, (1, 128))


def init_params(key, feats_dim, hidden_dim):
    ks = jax.random.split(key, 9)
    sc = 0.1
    return {
        "w_fc": sc * jax.random.normal(ks[0], (feats_dim, feats_dim), jnp.float32),  # (out,in)
        "b_fc": sc * jax.random.normal(ks[1], (feats_dim,), jnp.float32),
        "w_mp": sc * jax.random.normal(ks[2], (feats_dim, hidden_dim), jnp.float32),  # GCN (in,out)
        "b_mp": jnp.zeros((hidden_dim,), jnp.float32),
        "w_sc": sc * jax.random.normal(ks[3], (feats_dim, hidden_dim), jnp.float32),  # GAT (in,out)
        "a_l": sc * jax.random.normal(ks[4], (hidden_dim,), jnp.float32),
        "a_r": sc * jax.random.normal(ks[5], (hidden_dim,), jnp.float32),
        "w_p1": sc * jax.random.normal(ks[6], (hidden_dim, hidden_dim), jnp.float32),  # (out,in)
        "b_p1": jnp.zeros((hidden_dim,), jnp.float32),
        "w_p2": sc * jax.random.normal(ks[7], (hidden_dim, hidden_dim), jnp.float32),  # (out,in)
        "b_p2": jnp.zeros((hidden_dim,), jnp.float32),
    }


def heco_forward(x, adj, e, A, pos, params):
    # TODO(synk): the `e` argument of HeCo.forward has no definition in the provided
    # source (Mp_encoder internals not given); it is accepted but unused here.
    del e
    f32 = jnp.float32
    H = params["w_mp"].shape[1]

    # ---- fold fc_list (h = x @ W_fc^T + b_fc) into the encoder weights ----------------
    w_fc_t = params["w_fc"].T.astype(f32)                 # (D, D)
    b_fc = params["b_fc"].astype(f32)                     # (D,)
    w_mp_fold = w_fc_t @ params["w_mp"].astype(f32)       # (D, H)
    w_sc_fold = w_fc_t @ params["w_sc"].astype(f32)       # (D, H)
    w_enc = jnp.stack([w_mp_fold, w_sc_fold], axis=0)     # (2, D, H)
    w_proj = jnp.stack([params["w_p1"].T.astype(f32),
                        params["w_p2"].T.astype(f32)], axis=0)   # (2, H, H)

    # ---- pack all small vectors into one (8, H) slab -> a single (8,128)-padded tile --
    vecs = jnp.zeros((8, H), f32)
    vecs = vecs.at[0].set(b_fc @ params["w_mp"].astype(f32))     # pre-aggregation mp bias
    vecs = vecs.at[1].set(params["b_mp"].astype(f32))            # post-aggregation mp bias
    vecs = vecs.at[2].set(b_fc @ params["w_sc"].astype(f32))     # folded sc bias
    vecs = vecs.at[3].set(params["a_l"].astype(f32))
    vecs = vecs.at[4].set(params["a_r"].astype(f32))
    vecs = vecs.at[5].set(params["b_p1"].astype(f32))
    vecs = vecs.at[6].set(params["b_p2"].astype(f32))

    pos_f = pos.astype(f32)
    pos_pack = jnp.stack([pos_f, pos_f.T], axis=0)               # (2, N, N): pos and pos^T

    inputs = (
        x.astype(f32), adj.astype(f32), A.astype(f32), pos_pack,
        w_enc, w_proj, vecs,
    )

    vmem = pl.BlockSpec(memory_space=pltpu.MemorySpace.VMEM)
    out = pl.pallas_call(
        heco_kernel,
        out_shape=jax.ShapeDtypeStruct((1, 128), jnp.float32),
        in_specs=[vmem] * len(inputs),          # whole arrays fit VMEM; no grid tiling
        out_specs=vmem,
    )(*inputs)
    return out[0, 0]


if __name__ == "__main__":
    key = jax.random.PRNGKey(0)
    k_par, k_x, k_adj, k_A, k_pos, k_e = jax.random.split(key, 6)

    N, D, H = N_NODES, FEATS_DIM, HIDDEN_DIM
    params = init_params(k_par, D, H)

    x = jax.random.normal(k_x, (N, D), jnp.float32)

    eye = jnp.eye(N, dtype=jnp.float32)
    # meta-path adjacency: random + self-loops, row-normalized
    adj_bin = jnp.clip((jax.random.uniform(k_adj, (N, N)) < 0.3).astype(jnp.float32) + eye, 0.0, 1.0)
    adj = adj_bin / jnp.sum(adj_bin, axis=1, keepdims=True)
    # schema adjacency: binary + self-loops
    A = jnp.clip((jax.random.uniform(k_A, (N, N)) < 0.3).astype(jnp.float32) + eye, 0.0, 1.0)
    # positive-pair mask: self + symmetric random positives
    p = (jax.random.uniform(k_pos, (N, N)) < 0.15).astype(jnp.float32)
    pos = jnp.clip(p + p.T + eye, 0.0, 1.0)
    # unused edge-info placeholder (see TODO above)
    e = jnp.ones((N, N), jnp.float32)

    loss = heco_forward(x, adj, e, A, pos, params)
    loss = jax.block_until_ready(loss)
    assert bool(jnp.isfinite(loss)), "loss is not finite"
    print("KERNEL_OK")
</pallas_src>

<mosaic_0001>
module attributes {stable_mosaic.version = 11 : i64} {
  func.func @heco_kernel(%arg0: memref<16x64xf32, #tpu.memory_space<vmem>>, %arg1: memref<16x16xf32, #tpu.memory_space<vmem>>, %arg2: memref<16x16xf32, #tpu.memory_space<vmem>>, %arg3: memref<2x16x16xf32, #tpu.memory_space<vmem>>, %arg4: memref<2x64x32xf32, #tpu.memory_space<vmem>>, %arg5: memref<2x32x32xf32, #tpu.memory_space<vmem>>, %arg6: memref<8x32xf32, #tpu.memory_space<vmem>>, %arg7: memref<1x128xf32, #tpu.memory_space<vmem>>) attributes {dimension_semantics = [], scalar_prefetch = 0 : i64, scratch_operands = 0 : i64, tpu.core_type = #tpu.core_type<tc>} {
    %c0 = arith.constant 0 : index
    %c0_0 = arith.constant 0 : index
    %0 = vector.load %arg0[%c0, %c0_0] : memref<16x64xf32, #tpu.memory_space<vmem>>, vector<16x64xf32>
    %c0_1 = arith.constant 0 : index
    %c0_2 = arith.constant 0 : index
    %1 = vector.load %arg6[%c0_1, %c0_2] : memref<8x32xf32, #tpu.memory_space<vmem>>, vector<1x32xf32>
    %c1 = arith.constant 1 : index
    %c0_3 = arith.constant 0 : index
    %2 = vector.load %arg6[%c1, %c0_3] : memref<8x32xf32, #tpu.memory_space<vmem>>, vector<1x32xf32>
    %c2 = arith.constant 2 : index
    %c0_4 = arith.constant 0 : index
    %3 = vector.load %arg6[%c2, %c0_4] : memref<8x32xf32, #tpu.memory_space<vmem>>, vector<1x32xf32>
    %c3 = arith.constant 3 : index
    %c0_5 = arith.constant 0 : index
    %4 = vector.load %arg6[%c3, %c0_5] : memref<8x32xf32, #tpu.memory_space<vmem>>, vector<1x32xf32>
    %c4 = arith.constant 4 : index
    %c0_6 = arith.constant 0 : index
    %5 = vector.load %arg6[%c4, %c0_6] : memref<8x32xf32, #tpu.memory_space<vmem>>, vector<1x32xf32>
    %c5 = arith.constant 5 : index
    %c0_7 = arith.constant 0 : index
    %6 = vector.load %arg6[%c5, %c0_7] : memref<8x32xf32, #tpu.memory_space<vmem>>, vector<1x32xf32>
    %c6 = arith.constant 6 : index
    %c0_8 = arith.constant 0 : index
    %7 = vector.load %arg6[%c6, %c0_8] : memref<8x32xf32, #tpu.memory_space<vmem>>, vector<1x32xf32>
    %c0_9 = arith.constant 0 : index
    %c0_10 = arith.constant 0 : index
    %c0_11 = arith.constant 0 : index
    %8 = vector.load %arg4[%c0_9, %c0_10, %c0_11] : memref<2x64x32xf32, #tpu.memory_space<vmem>>, vector<1x64x32xf32>
    %9 = vector.shape_cast %8 : vector<1x64x32xf32> to vector<64x32xf32>
    %cst = arith.constant dense<0.000000e+00> : vector<16x32xf32>
    %10 = tpu.matmul %0, %9, %cst {dimension_numbers = #tpu.dot_dimension_numbers<[1], [0], [0], [1], [0, 0, 1, 1], [], []>} : vector<16x64xf32>, vector<64x32xf32>, vector<16x32xf32> -> vector<16x32xf32>
    %11 = vector.broadcast %1 : vector<1x32xf32> to vector<16x32xf32>
    %12 = arith.addf %10, %11 : vector<16x32xf32>
    %c0_12 = arith.constant 0 : index
    %c0_13 = arith.constant 0 : index
    %13 = vector.load %arg1[%c0_12, %c0_13] : memref<16x16xf32, #tpu.memory_space<vmem>>, vector<16x16xf32>
    %cst_14 = arith.constant dense<0.000000e+00> : vector<16x32xf32>
    %14 = tpu.matmul %13, %12, %cst_14 {dimension_numbers = #tpu.dot_dimension_numbers<[1], [0], [0], [1], [0, 0, 1, 1], [], []>} : vector<16x16xf32>, vector<16x32xf32>, vector<16x32xf32> -> vector<16x32xf32>
    %15 = vector.broadcast %2 : vector<1x32xf32> to vector<16x32xf32>
    %16 = arith.addf %14, %15 : vector<16x32xf32>
    %cst_15 = arith.constant 0.000000e+00 : f32
    %17 = vector.broadcast %cst_15 : f32 to vector<16x32xf32>
    %18 = arith.cmpf ogt, %16, %17 : vector<16x32xf32>
    %cst_16 = arith.constant 2.500000e-01 : f32
    %19 = vector.broadcast %cst_16 : f32 to vector<16x32xf32>
    %20 = arith.mulf %19, %16 : vector<16x32xf32>
    %21 = arith.select %18, %16, %20 : vector<16x32xi1>, vector<16x32xf32>
    %c1_17 = arith.constant 1 : index
    %c0_18 = arith.constant 0 : index
    %c0_19 = arith.constant 0 : index
    %22 = vector.load %arg4[%c1_17, %c0_18, %c0_19] : memref<2x64x32xf32, #tpu.memory_space<vmem>>, vector<1x64x32xf32>
    %23 = vector.shape_cast %22 : vector<1x64x32xf32> to vector<64x32xf32>
    %cst_20 = arith.constant dense<0.000000e+00> : vector<16x32xf32>
    %24 = tpu.matmul %0, %23, %cst_20 {dimension_numbers = #tpu.dot_dimension_numbers<[1], [0], [0], [1], [0, 0, 1, 1], [], []>} : vector<16x64xf32>, vector<64x32xf32>, vector<16x32xf32> -> vector<16x32xf32>
    %25 = vector.broadcast %3 : vector<1x32xf32> to vector<16x32xf32>
    %26 = arith.addf %24, %25 : vector<16x32xf32>
    %27 = vector.broadcast %4 : vector<1x32xf32> to vector<16x32xf32>
    %28 = arith.mulf %26, %27 : vector<16x32xf32>
    %cst_21 = arith.constant dense<0.000000e+00> : vector<16xf32>
    %29 = vector.multi_reduction <add>, %28, %cst_21 [1] : vector<16x32xf32> to vector<16xf32>
    %30 = vector.shape_cast %29 : vector<16xf32> to vector<16x1xf32>
    %cst_22 = arith.constant dense<0.000000e+00> : vector<1x16xf32>
    %31 = tpu.matmul %5, %26, %cst_22 {dimension_numbers = #tpu.dot_dimension_numbers<[1], [1], [0], [0], [0, 0, 1, 0], [], []>} : vector<1x32xf32>, vector<16x32xf32>, vector<1x16xf32> -> vector<1x16xf32>
    %32 = vector.broadcast %30 : vector<16x1xf32> to vector<16x16xf32>
    %33 = vector.broadcast %31 : vector<1x16xf32> to vector<16x16xf32>
    %34 = arith.addf %32, %33 : vector<16x16xf32>
    %cst_23 = arith.constant 0.000000e+00 : f32
    %35 = vector.broadcast %cst_23 : f32 to vector<16x16xf32>
    %36 = arith.cmpf ogt, %34, %35 : vector<16x16xf32>
    %cst_24 = arith.constant 2.000000e-01 : f32
    %37 = vector.broadcast %cst_24 : f32 to vector<16x16xf32>
    %38 = arith.mulf %37, %34 : vector<16x16xf32>
    %39 = arith.select %36, %34, %38 : vector<16x16xi1>, vector<16x16xf32>
    %c0_25 = arith.constant 0 : index
    %c0_26 = arith.constant 0 : index
    %40 = vector.load %arg2[%c0_25, %c0_26] : memref<16x16xf32, #tpu.memory_space<vmem>>, vector<16x16xf32>
    %cst_27 = arith.constant 0.000000e+00 : f32
    %41 = vector.broadcast %cst_27 : f32 to vector<16x16xf32>
    %42 = arith.cmpf ogt, %40, %41 : vector<16x16xf32>
    %cst_28 = arith.constant -1.000000e+09 : f32
    %43 = vector.broadcast %cst_28 : f32 to vector<16x16xf32>
    %44 = arith.select %42, %39, %43 : vector<16x16xi1>, vector<16x16xf32>
    %cst_29 = arith.constant dense<0xFF800000> : vector<16xf32>
    %45 = vector.multi_reduction <maximumf>, %44, %cst_29 [1] : vector<16x16xf32> to vector<16xf32>
    %46 = vector.shape_cast %45 : vector<16xf32> to vector<16x1xf32>
    %47 = vector.broadcast %46 : vector<16x1xf32> to vector<16x16xf32>
    %48 = arith.subf %44, %47 : vector<16x16xf32>
    %cst_30 = arith.constant 0.000000e+00 : f32
    %49 = vector.broadcast %cst_30 : f32 to vector<16x16xf32>
    %50 = arith.cmpf ogt, %40, %49 : vector<16x16xf32>
    %51 = math.exp %48 : vector<16x16xf32>
    %cst_31 = arith.constant 0.000000e+00 : f32
    %52 = vector.broadcast %cst_31 : f32 to vector<16x16xf32>
    %53 = arith.select %50, %51, %52 : vector<16x16xi1>, vector<16x16xf32>
    %cst_32 = arith.constant dense<0.000000e+00> : vector<16xf32>
    %54 = vector.multi_reduction <add>, %53, %cst_32 [1] : vector<16x16xf32> to vector<16xf32>
    %55 = vector.shape_cast %54 : vector<16xf32> to vector<16x1xf32>
    %cst_33 = arith.constant 9.99999993E-9 : f32
    %56 = vector.broadcast %cst_33 : f32 to vector<16x1xf32>
    %57 = arith.addf %55, %56 : vector<16x1xf32>
    %58 = tpu.reciprocal %57 {approx = true} : vector<16x1xf32> -> vector<16x1xf32>
    %59 = vector.broadcast %58 : vector<16x1xf32> to vector<16x16xf32>
    %60 = arith.mulf %53, %59 : vector<16x16xf32>
    %cst_34 = arith.constant dense<0.000000e+00> : vector<16x32xf32>
    %61 = tpu.matmul %60, %26, %cst_34 {dimension_numbers = #tpu.dot_dimension_numbers<[1], [0], [0], [1], [0, 0, 1, 1], [], []>} : vector<16x16xf32>, vector<16x32xf32>, vector<16x32xf32> -> vector<16x32xf32>
    %cst_35 = arith.constant 0.000000e+00 : f32
    %62 = vector.broadcast %cst_35 : f32 to vector<16x32xf32>
    %63 = arith.cmpf ogt, %61, %62 : vector<16x32xf32>
    %cst_36 = arith.constant 0.000000e+00 : f32
    %64 = vector.broadcast %cst_36 : f32 to vector<16x32xf32>
    %65 = arith.minimumf %61, %64 : vector<16x32xf32>
    %66 = math.exp %65 : vector<16x32xf32>
    %cst_37 = arith.constant 1.000000e+00 : f32
    %67 = vector.broadcast %cst_37 : f32 to vector<16x32xf32>
    %68 = arith.subf %66, %67 : vector<16x32xf32>
    %69 = arith.select %63, %61, %68 : vector<16x32xi1>, vector<16x32xf32>
    %c0_38 = arith.constant 0 : index
    %c0_39 = arith.constant 0 : index
    %c0_40 = arith.constant 0 : index
    %70 = vector.load %arg5[%c0_38, %c0_39, %c0_40] : memref<2x32x32xf32, #tpu.memory_space<vmem>>, vector<1x32x32xf32>
    %71 = vector.shape_cast %70 : vector<1x32x32xf32> to vector<32x32xf32>
    %cst_41 = arith.constant dense<0.000000e+00> : vector<16x32xf32>
    %72 = tpu.matmul %21, %71, %cst_41 {dimension_numbers = #tpu.dot_dimension_numbers<[1], [0], [0], [1], [0, 0, 1, 1], [], []>} : vector<16x32xf32>, vector<32x32xf32>, vector<16x32xf32> -> vector<16x32xf32>
    %73 = vector.broadcast %6 : vector<1x32xf32> to vector<16x32xf32>
    %74 = arith.addf %72, %73 : vector<16x32xf32>
    %cst_42 = arith.constant 0.000000e+00 : f32
    %75 = vector.broadcast %cst_42 : f32 to vector<16x32xf32>
    %76 = arith.cmpf ogt, %74, %75 : vector<16x32xf32>
    %cst_43 = arith.constant 0.000000e+00 : f32
    %77 = vector.broadcast %cst_43 : f32 to vector<16x32xf32>
    %78 = arith.minimumf %74, %77 : vector<16x32xf32>
    %79 = math.exp %78 : vector<16x32xf32>
    %cst_44 = arith.constant 1.000000e+00 : f32
    %80 = vector.broadcast %cst_44 : f32 to vector<16x32xf32>
    %81 = arith.subf %79, %80 : vector<16x32xf32>
    %82 = arith.select %76, %74, %81 : vector<16x32xi1>, vector<16x32xf32>
    %c1_45 = arith.constant 1 : index
    %c0_46 = arith.constant 0 : index
    %c0_47 = arith.constant 0 : index
    %83 = vector.load %arg5[%c1_45, %c0_46, %c0_47] : memref<2x32x32xf32, #tpu.memory_space<vmem>>, vector<1x32x32xf32>
    %84 = vector.shape_cast %83 : vector<1x32x32xf32> to vector<32x32xf32>
    %cst_48 = arith.constant dense<0.000000e+00> : vector<16x32xf32>
    %85 = tpu.matmul %82, %84, %cst_48 {dimension_numbers = #tpu.dot_dimension_numbers<[1], [0], [0], [1], [0, 0, 1, 1], [], []>} : vector<16x32xf32>, vector<32x32xf32>, vector<16x32xf32> -> vector<16x32xf32>
    %86 = vector.broadcast %7 : vector<1x32xf32> to vector<16x32xf32>
    %87 = arith.addf %85, %86 : vector<16x32xf32>
    %c0_49 = arith.constant 0 : index
    %c0_50 = arith.constant 0 : index
    %c0_51 = arith.constant 0 : index
    %88 = vector.load %arg5[%c0_49, %c0_50, %c0_51] : memref<2x32x32xf32, #tpu.memory_space<vmem>>, vector<1x32x32xf32>
    %89 = vector.shape_cast %88 : vector<1x32x32xf32> to vector<32x32xf32>
    %cst_52 = arith.constant dense<0.000000e+00> : vector<16x32xf32>
    %90 = tpu.matmul %69, %89, %cst_52 {dimension_numbers = #tpu.dot_dimension_numbers<[1], [0], [0], [1], [0, 0, 1, 1], [], []>} : vector<16x32xf32>, vector<32x32xf32>, vector<16x32xf32> -> vector<16x32xf32>
    %91 = vector.broadcast %6 : vector<1x32xf32> to vector<16x32xf32>
    %92 = arith.addf %90, %91 : vector<16x32xf32>
    %cst_53 = arith.constant 0.000000e+00 : f32
    %93 = vector.broadcast %cst_53 : f32 to vector<16x32xf32>
    %94 = arith.cmpf ogt, %92, %93 : vector<16x32xf32>
    %cst_54 = arith.constant 0.000000e+00 : f32
    %95 = vector.broadcast %cst_54 : f32 to vector<16x32xf32>
    %96 = arith.minimumf %92, %95 : vector<16x32xf32>
    %97 = math.exp %96 : vector<16x32xf32>
    %cst_55 = arith.constant 1.000000e+00 : f32
    %98 = vector.broadcast %cst_55 : f32 to vector<16x32xf32>
    %99 = arith.subf %97, %98 : vector<16x32xf32>
    %100 = arith.select %94, %92, %99 : vector<16x32xi1>, vector<16x32xf32>
    %c1_56 = arith.constant 1 : index
    %c0_57 = arith.constant 0 : index
    %c0_58 = arith.constant 0 : index
    %101 = vector.load %arg5[%c1_56, %c0_57, %c0_58] : memref<2x32x32xf32, #tpu.memory_space<vmem>>, vector<1x32x32xf32>
    %102 = vector.shape_cast %101 : vector<1x32x32xf32> to vector<32x32xf32>
    %cst_59 = arith.constant dense<0.000000e+00> : vector<16x32xf32>
    %103 = tpu.matmul %100, %102, %cst_59 {dimension_numbers = #tpu.dot_dimension_numbers<[1], [0], [0], [1], [0, 0, 1, 1], [], []>} : vector<16x32xf32>, vector<32x32xf32>, vector<16x32xf32> -> vector<16x32xf32>
    %104 = vector.broadcast %7 : vector<1x32xf32> to vector<16x32xf32>
    %105 = arith.addf %103, %104 : vector<16x32xf32>
    %106 = arith.mulf %87, %87 : vector<16x32xf32>
    %cst_60 = arith.constant dense<0.000000e+00> : vector<16xf32>
    %107 = vector.multi_reduction <add>, %106, %cst_60 [1] : vector<16x32xf32> to vector<16xf32>
    %108 = vector.shape_cast %107 : vector<16xf32> to vector<16x1xf32>
    %cst_61 = arith.constant 9.99999993E-9 : f32
    %109 = vector.broadcast %cst_61 : f32 to vector<16x1xf32>
    %110 = arith.addf %108, %109 : vector<16x1xf32>
    %111 = math.rsqrt %110 : vector<16x1xf32>
    %112 = vector.broadcast %111 : vector<16x1xf32> to vector<16x32xf32>
    %113 = arith.mulf %87, %112 : vector<16x32xf32>
    %114 = arith.mulf %105, %105 : vector<16x32xf32>
    %cst_62 = arith.constant dense<0.000000e+00> : vector<16xf32>
    %115 = vector.multi_reduction <add>, %114, %cst_62 [1] : vector<16x32xf32> to vector<16xf32>
    %116 = vector.shape_cast %115 : vector<16xf32> to vector<16x1xf32>
    %cst_63 = arith.constant 9.99999993E-9 : f32
    %117 = vector.broadcast %cst_63 : f32 to vector<16x1xf32>
    %118 = arith.addf %116, %117 : vector<16x1xf32>
    %119 = math.rsqrt %118 : vector<16x1xf32>
    %120 = vector.broadcast %119 : vector<16x1xf32> to vector<16x32xf32>
    %121 = arith.mulf %105, %120 : vector<16x32xf32>
    %cst_64 = arith.constant dense<0.000000e+00> : vector<16x16xf32>
    %122 = tpu.matmul %113, %121, %cst_64 {dimension_numbers = #tpu.dot_dimension_numbers<[1], [1], [0], [0], [0, 0, 1, 0], [], []>} : vector<16x32xf32>, vector<16x32xf32>, vector<16x16xf32> -> vector<16x16xf32>
    %cst_65 = arith.constant 1.250000e+00 : f32
    %123 = vector.broadcast %cst_65 : f32 to vector<16x16xf32>
    %124 = arith.mulf %122, %123 : vector<16x16xf32>
    %125 = math.exp %124 : vector<16x16xf32>
    %c0_66 = arith.constant 0 : index
    %c0_67 = arith.constant 0 : index
    %c0_68 = arith.constant 0 : index
    %126 = vector.load %arg3[%c0_66, %c0_67, %c0_68] : memref<2x16x16xf32, #tpu.memory_space<vmem>>, vector<1x16x16xf32>
    %127 = vector.shape_cast %126 : vector<1x16x16xf32> to vector<16x16xf32>
    %c1_69 = arith.constant 1 : index
    %c0_70 = arith.constant 0 : index
    %c0_71 = arith.constant 0 : index
    %128 = vector.load %arg3[%c1_69, %c0_70, %c0_71] : memref<2x16x16xf32, #tpu.memory_space<vmem>>, vector<1x16x16xf32>
    %129 = vector.shape_cast %128 : vector<1x16x16xf32> to vector<16x16xf32>
    %cst_72 = arith.constant dense<0.000000e+00> : vector<16xf32>
    %130 = vector.multi_reduction <add>, %125, %cst_72 [1] : vector<16x16xf32> to vector<16xf32>
    %131 = vector.shape_cast %130 : vector<16xf32> to vector<16x1xf32>
    %cst_73 = arith.constant 9.99999993E-9 : f32
    %132 = vector.broadcast %cst_73 : f32 to vector<16x1xf32>
    %133 = arith.addf %131, %132 : vector<16x1xf32>
    %134 = tpu.reciprocal %133 {approx = true} : vector<16x1xf32> -> vector<16x1xf32>
    %135 = arith.mulf %125, %127 : vector<16x16xf32>
    %cst_74 = arith.constant dense<0.000000e+00> : vector<16xf32>
    %136 = vector.multi_reduction <add>, %135, %cst_74 [1] : vector<16x16xf32> to vector<16xf32>
    %137 = vector.shape_cast %136 : vector<16xf32> to vector<16x1xf32>
    %138 = arith.mulf %137, %134 : vector<16x1xf32>
    %139 = math.log %138 : vector<16x1xf32>
    %cst_75 = arith.constant dense<0.000000e+00> : vector<1xf32>
    %140 = vector.multi_reduction <add>, %139, %cst_75 [0] : vector<16x1xf32> to vector<1xf32>
    %141 = vector.shape_cast %140 : vector<1xf32> to vector<1x1xf32>
    %cst_76 = arith.constant 0.000000e+00 : f32
    %142 = vector.broadcast %cst_76 : f32 to vector<1x1xf32>
    %143 = arith.subf %142, %141 : vector<1x1xf32>
    %cst_77 = arith.constant 6.250000e-02 : f32
    %144 = vector.broadcast %cst_77 : f32 to vector<1x1xf32>
    %145 = arith.mulf %143, %144 : vector<1x1xf32>
    %cst_78 = arith.constant dense<0.000000e+00> : vector<16xf32>
    %146 = vector.multi_reduction <add>, %125, %cst_78 [0] : vector<16x16xf32> to vector<16xf32>
    %147 = vector.shape_cast %146 : vector<16xf32> to vector<1x16xf32>
    %cst_79 = arith.constant 9.99999993E-9 : f32
    %148 = vector.broadcast %cst_79 : f32 to vector<1x16xf32>
    %149 = arith.addf %147, %148 : vector<1x16xf32>
    %150 = tpu.reciprocal %149 {approx = true} : vector<1x16xf32> -> vector<1x16xf32>
    %151 = arith.mulf %125, %129 : vector<16x16xf32>
    %cst_80 = arith.constant dense<0.000000e+00> : vector<16xf32>
    %152 = vector.multi_reduction <add>, %151, %cst_80 [0] : vector<16x16xf32> to vector<16xf32>
    %153 = vector.shape_cast %152 : vector<16xf32> to vector<1x16xf32>
    %154 = arith.mulf %153, %150 : vector<1x16xf32>
    %155 = math.log %154 : vector<1x16xf32>
    %cst_81 = arith.constant dense<0.000000e+00> : vector<1xf32>
    %156 = vector.multi_reduction <add>, %155, %cst_81 [1] : vector<1x16xf32> to vector<1xf32>
    %157 = vector.shape_cast %156 : vector<1xf32> to vector<1x1xf32>
    %cst_82 = arith.constant 0.000000e+00 : f32
    %158 = vector.broadcast %cst_82 : f32 to vector<1x1xf32>
    %159 = arith.subf %158, %157 : vector<1x1xf32>
    %cst_83 = arith.constant 6.250000e-02 : f32
    %160 = vector.broadcast %cst_83 : f32 to vector<1x1xf32>
    %161 = arith.mulf %159, %160 : vector<1x1xf32>
    %cst_84 = arith.constant 5.000000e-01 : f32
    %162 = vector.broadcast %cst_84 : f32 to vector<1x1xf32>
    %163 = arith.mulf %162, %145 : vector<1x1xf32>
    %cst_85 = arith.constant 5.000000e-01 : f32
    %164 = vector.broadcast %cst_85 : f32 to vector<1x1xf32>
    %165 = arith.mulf %164, %161 : vector<1x1xf32>
    %166 = arith.addf %163, %165 : vector<1x1xf32>
    %167 = vector.shape_cast %166 : vector<1x1xf32> to vector<1x1xf32>
    %168 = vector.broadcast %167 : vector<1x1xf32> to vector<1x128xf32>
    %c0_86 = arith.constant 0 : index
    %c0_87 = arith.constant 0 : index
    %169 = vector.load %arg7[%c0_86, %c0_87] : memref<1x128xf32, #tpu.memory_space<vmem>>, vector<1x128xf32>
    tpu.vector_store %arg7[%c0_86, %c0_87], %168 {strides = array<i32>} : memref<1x128xf32, #tpu.memory_space<vmem>>, vector<1x128xf32>,
    return
  }
}

</mosaic_0001>

<bundles_post_ra>
// kernel: tpu_custom_call.1
= control target key start
LH: loop header
LB: loop body
LE: loop exit
PB: predicated region body
PF: predicated region fallthrough
CT: control target
= control target key end

     0   :  { %vm48_vm0 = vcmask 523264   ;;  %s1720_s0 = inlined_call_operand.vmem [shape: f32[16,64], index: 0, kind: input, shape index: {}]   ;;  %s1721_s1 = inlined_call_operand.vmem [shape: f32[16,16], index: 1, kind: input, shape index: {}]   ;;  %s1722_s2 = inlined_call_operand.vmem [shape: f32[16,16], index: 2, kind: input, shape index: {}]   ;;  %s1723_s3 = inlined_call_operand.vmem [shape: f32[2,16,16], index: 3, kind: input, shape index: {}]   ;;  %s1724_s4 = inlined_call_operand.vmem [shape: f32[2,64,32], index: 4, kind: input, shape index: {}]   ;;  %s1725_s5 = inlined_call_operand.vmem [shape: f32[2,32,32], index: 5, kind: input, shape index: {}]   ;;  %s1726_s6 = inlined_call_operand.vmem [shape: f32[8,32], index: 6, kind: input, shape index: {}]   ;;  %s1727_s7 = inlined_call_operand.hbm [shape: f32[1,128], index: 7, kind: output, shape index: {}]  }
   0x1   :  { %v36_v0 = vld [vmem:[%s1724_s4] sm:$0xff]  ;;  %v37_v1 = vld [vmem:[%s1724_s4 + $0x8] sm:$0xff]  ;;  %v38_v2 = vld [vmem:[%s1724_s4 + $0x10] sm:$0xff] }
   0x2   :  { %v1329_v3 = vpack.c.bf16 %v37_v1, %v36_v0  ;;  %v39_v4 = vld [vmem:[%s1724_s4 + $0x18] sm:$0xff]  ;;  %v40_v6 = vld [vmem:[%s1724_s4 + $0x20] sm:$0xff]  ;;  %v41_v7 = vld [vmem:[%s1724_s4 + $0x28] sm:$0xff] }
   0x3   :  { %v1333_v5 = vpack.c.bf16 %v39_v4, %v38_v2  ;;  %v27_v8 = vld [vmem:[%s1720_s0] sm:$0xff] }
   0x4   :  { %1330 = vmatprep.subr.bf16.mxu0 %v1329_v3  ;;  %1235 = vmatprep.mubr.msk.f32.mxu0 %vm48_vm0, %v27_v8 }
   0x5   :  { %12 = vsyncpa [#allocation3], 0  ;;  %1332 = vmatpush3.bf16.msra.mxu0 %v1329_v3  ;;  %v1337_v9 = vpack.c.bf16 %v41_v7, %v40_v6  ;;  %v42_v10 = vld [vmem:[%s1724_s4 + $0x30] sm:$0xff]  ;;  %v43_v11 = vld [vmem:[%s1724_s4 + $0x38] sm:$0xff]  ;;  %vm136_vm1 = vcmask 130048   ;;  %v1483_v34 = vmov 0.0|0.0   ;;  %v404_v0 = vlaneseq }
   0x6   :  { %1334 = vmatprep.subr.bf16.mxu0 %v1333_v5  ;;  %v1341_v12 = vpack.c.bf16 %v43_v11, %v42_v10  ;;  %v28_v13 = vld [vmem:[%s1720_s0 + $0x8] sm:$0xff]  ;;  %v130_v14 = vld [vmem:[%s1721_s1] sm:$0xff]  ;;  %v1119_v24 = vld [vmem:[%s1724_s4 + $0x50] sm:$0xff]  ;;  %vm1484_vm2 = vmmov 0   ;;  %v1485_v35 = vmov 0.0   ;;  %vm318_vm3 = vcmask 261120  }
   0x7   :  { %1242 = vmatprep.mubr.msk.f32.mxu1 %vm136_vm1, %v130_v14  ;;  %v1111_v15 = vld [vmem:[%s1726_s6] ss:$0 sm:$0xff]  ;;  %v1118_v20 = vld [vmem:[%s1724_s4 + $0x48] sm:$0xff]  ;;  %v1120_v25 = vld [vmem:[%s1724_s4 + $0x58] sm:$0xff]  ;;  %v405_v1 = vshrl.u32 %v404_v0, 7 }
   0x8   :  { %v1117_v19 = vld [vmem:[%s1724_s4 + $0x40] sm:$0xff]  ;;  %v131_v26 = vld [vmem:[%s1721_s1 + $0x8] sm:$0xff]  ;;  %v1353_v27 = vpack.c.bf16 %v1120_v25, %v1119_v24  ;;  %v1123_v31 = vld [vmem:[%s1724_s4 + $0x70] sm:$0xff] }
   0x9   :  { %1336 = vmatpush3.bf16.msra.mxu0 %v1333_v5  ;;  %v1349_v23 = vpack.c.bf16 %v1118_v20, %v1117_v19  ;;  %v1121_v28 = vld [vmem:[%s1724_s4 + $0x60] sm:$0xff]  ;;  %v1122_v29 = vld [vmem:[%s1724_s4 + $0x68] sm:$0xff]  ;;  %v1124_v32 = vld [vmem:[%s1724_s4 + $0x78] sm:$0xff]  ;;  %v406_v3 = vsub.s32 0, %v405_v1 }
   0xa   :  { %1338 = vmatprep.subr.bf16.mxu0 %v1337_v9  ;;  %v1357_v30 = vpack.c.bf16 %v1122_v29, %v1121_v28  ;;  %v1361_v33 = vpack.c.bf16 %v1124_v32, %v1123_v31  ;;  %v1125_v38 = vld [vmem:[%s1726_s6 + $0x2] ss:$0 sm:$0xff]  ;;  %v1128_v42 = vld [vmem:[%s1726_s6 + $0x3] ss:$0 sm:$0xff]  ;;  %v542_v44 = vld [vmem:[%s1725_s5 + $0x8] sm:$0xff] }
   0xb   :  { %v541_v43 = vld [vmem:[%s1725_s5] sm:$0xff]  ;;  %vm1613_vm4 = vmpackc.low %vm318_vm3, %vm318_vm3  ;;  %v543_v54 = vld [vmem:[%s1725_s5 + $0x10] sm:$0xff] }
   0xc   :  { %v1114_v45 = vld [vmem:[%s1726_s6 + $0x1] ss:$0 sm:$0xff]  ;;  %v1373_v50 = vpack.c.bf16 %v542_v44, %v541_v43  ;;  %v544_v55 = vld [vmem:[%s1725_s5 + $0x18] sm:$0xff]  ;;  %v33_v58 = vld [vmem:[%s1726_s6 + $0x4] sm:$0x1] }
   0xd   :  { %1340 = vmatpush3.bf16.msra.mxu0 %v1337_v9  ;;  %v1377_v59 = vpack.c.bf16 %v544_v55, %v543_v54  ;;  %v416_v7 = vld [vmem:[%s1722_s2] sm:$0xff]  ;;  %v417_v11 = vld [vmem:[%s1722_s2 + $0x8] sm:$0xff]  ;;  %v1159_v47 = vld [vmem:[%s1723_s3 + $0x18] sm:$0xff] }
   0xe   :  { %1342 = vmatprep.subr.bf16.mxu0 %v1341_v12  ;;  %vm418_vm7 = vcmp.gt.f32.partialorder %v416_v7, 0.0  ;;  %vm419_vm10 = vcmp.gt.f32.partialorder %v417_v11, 0.0 }
  0x11   :  { %1344 = vmatpush3.bf16.msra.mxu0 %v1341_v12 }
  0x12   :  { %1365 = vmatprep.subr.bf16.mxu0 %v1483_v34  ;;  %v1141_v34 = vld [vmem:[%s1725_s5 + $0x20] sm:$0xff] }
  0x14   :  { %1236 = vmatmul.mubr.msk.f32.vlgmr.msra.gmra.mrb[0].mxu0 %vm48_vm0, %v28_v13 }
  0x15   :  { %1268 = vmatprep.mubr.msk.f32.mxu0 %vm1484_vm2, %v1485_v35  ;;  %v1142_v35 = vld [vmem:[%s1725_s5 + $0x28] sm:$0xff] }
  0xe7   :  { %v1237_v16 = vpop.f32.mrb[0].mxu0 }
  0xe8   :  { %v127_v17 = vadd.f32 %v1237_v16, %v1111_v15  ;;  %v121_v18 = vpop.f32.mrb[1].mxu0 }
  0xe9   :  { %v122_v21 = vadd.f32 %v1111_v15, %v121_v18 }
  0xeb   :  { %v1345_v22 = vpack.c.bf16 %v127_v17, %v122_v21 }
  0xed   :  { %1346 = vmatprep.subr.bf16.mxu1 %v1345_v22 }
  0xee   :  { %1348 = vmatpush3.bf16.msra.mxu1 %v1345_v22 }
  0xef   :  { %1350 = vmatprep.subr.bf16.mxu1 %v1349_v23 }
  0xf1   :  { %1243 = vmatmul.mubr.msk.f32.vlgmr.msra.gmra.mrb[0].mxu1 %vm136_vm1, %v131_v26 }
  0xf2   :  { %1352 = vmatpush3.bf16.msra.mxu1 %v1349_v23  ;;  %1261 = vmatprep.mubr.msk.f32.mxu1 %vm48_vm0, %v27_v8 }
  0xf3   :  { %1354 = vmatprep.subr.bf16.mxu1 %v1353_v27 }
  0xf6   :  { %1356 = vmatpush3.bf16.msra.mxu1 %v1353_v27 }
  0xf7   :  { %1358 = vmatprep.subr.bf16.mxu1 %v1357_v30 }
  0xfa   :  { %1360 = vmatpush3.bf16.msra.mxu1 %v1357_v30 }
  0xfb   :  { %1362 = vmatprep.subr.bf16.mxu1 %v1361_v33 }
  0xfe   :  { %1364 = vmatpush3.bf16.msra.mxu1 %v1361_v33 }
 0x101   :  { %1262 = vmatmul.mubr.msk.f32.vlgmr.msra.gmra.mrb[2].mxu1 %vm48_vm0, %v28_v13 }
 0x1c4   :  { %v1244_v36 = vpop.f32.mrb[0].mxu1 }
 0x1c5   :  { %v209_v37 = vpop.f32.mrb[1].mxu1  ;;  %v215_v60 = vadd.f32 %v1244_v36, %v1114_v45  ;;  %v1381_v36 = vpack.c.bf16 %v1142_v35, %v1141_v34 }
 0x1c6   :  { %v210_v51 = vadd.f32 %v1114_v45, %v209_v37  ;;  %v1656_v37 = vld [vmem:[%s1726_s6 + $0x5] ss:$0 sm:$0xff] }
 0x1c7   :  { %v221_v62 = vmul.f32 0.25, %v215_v60  ;;  %vm219_vm6 = vcmp.gt.f32.partialorder %v215_v60, 0.0 }
 0x1c8   :  { %v220_v56 = vmul.f32 0.25, %v210_v51  ;;  %vm218_vm5 = vcmp.gt.f32.partialorder %v210_v51, 0.0 }
 0x1c9   :  { %v223_v63 = vsel %vm219_vm6, %v215_v60, %v221_v62 }
 0x1ca   :  { %v222_v61 = vsel %vm218_vm5, %v210_v51, %v220_v56 }
 0x1d4   :  { %v1263_v39 = vpop.f32.mrb[2].mxu1 }
 0x1d5   :  { %v309_v40 = vadd.f32 %v1263_v39, %v1125_v38  ;;  %v303_v41 = vpop.f32.mrb[3].mxu1 }
 0x1d6   :  { %v304_v46 = vadd.f32 %v1125_v38, %v303_v41 }
 0x1d7   :  { %v317_v53 = vmul.f32 %v1128_v42, %v309_v40 }
 0x1d8   :  { %v1366_v48 = vpack.c.bf16 %v309_v40, %v304_v46  ;;  %v316_v49 = vmul.f32 %v1128_v42, %v304_v46 }
 0x1d9   :  { %v322_v57 = vsel %vm318_vm3, %v317_v53, 0.0  ;;  %v1144_v53 = vld [vmem:[%s1725_s5 + $0x38] sm:$0xff] }
 0x1da   :  { %1368 = vmatpush3.bf16.xpose.msk.msra.mxu0 %vm1613_vm4, %v1366_v48  ;;  %1370 = vmatprep.subr.bf16.mxu1 %v1366_v48  ;;  %v319_v52 = vsel %vm318_vm3, %v316_v49, 0.0 }
 0x1db   :  { %1372 = vmatpush3.bf16.msra.mxu1 %v1366_v48  ;;  %320 = vadd.xlane.f32.xlu0 %v319_v52  ;;  %v1143_v52 = vld [vmem:[%s1725_s5 + $0x30] sm:$0xff] }
 0x1dc   :  { %1374 = vmatprep.subr.bf16.mxu0 %v1373_v50  ;;  %1382 = vmatprep.subr.bf16.mxu1 %v1381_v36 }
 0x1df   :  { %323 = vadd.xlane.f32.xlu0 %v322_v57  ;;  %v1385_v57 = vpack.c.bf16 %v1144_v53, %v1143_v52 }
 0x1e1   :  { %1269 = vmatmul.mubr.msk.f32.vlgmr.msra.gmra.mrb[2].mxu0 %vm318_vm3, %v33_v58 }
 0x1e2   :  { %1376 = vmatpush3.bf16.msra.mxu0 %v1373_v50  ;;  %1286 = vmatprep.mubr.msk.f32.mxu0 %vm318_vm3, %v222_v61 }
 0x1e3   :  { %1378 = vmatprep.subr.bf16.mxu0 %v1377_v59 }
 0x1e6   :  { %1380 = vmatpush3.bf16.msra.mxu0 %v1377_v59 }
 0x1e7   :  { %1390 = vmatprep.subr.bf16.mxu0 %v1373_v50 }
 0x1e9   :  { %1287 = vmatmul.mubr.msk.f32.vlgmr.msra.gmra.mrb[4].mxu0 %vm318_vm3, %v223_v63 }
 0x1ea   :  { %1392 = vmatpush3.bf16.msra.mxu0 %v1373_v50 }
 0x1eb   :  { %1394 = vmatprep.subr.bf16.mxu0 %v1377_v59 }
 0x1ee   :  { %1396 = vmatpush3.bf16.msra.mxu0 %v1377_v59 }
 0x268   :  { %v321_v2 = vpop.xlane.xlu0 %320 }
 0x26c   :  { %v324_v8 = vpop.xlane.xlu0 %323 }
 0x2b4   :  { %v400_v4 = vpop.f32.mrb[2].mxu0 }
 0x2b5   :  { %v407_v5 = vrot.slane %v400_v4, %v406_v3  ;;  %v1270_v6 = vpop.f32.mrb[3].mxu0 }
 0x2b7   :  { %v408_v9 = vadd.f32 %v407_v5, %v321_v2  ;;  %v409_v10 = vadd.f32 %v407_v5, %v324_v8 }
 0x2b9   :  { %vm410_vm8 = vcmp.gt.f32.partialorder %v408_v9, 0.0  ;;  %v412_v12 = vmul.f32 0.2, %v408_v9  ;;  %vm411_vm9 = vcmp.gt.f32.partialorder %v409_v10, 0.0  ;;  %v413_v13 = vmul.f32 0.2, %v409_v10 }
 0x2bb   :  { %v414_v14 = vsel %vm410_vm8, %v408_v9, %v412_v12  ;;  %v415_v15 = vsel %vm411_vm9, %v409_v10, %v413_v13 }
 0x2bc   :  { %v1288_v16 = vpop.f32.mrb[4].mxu0  ;;  %v420_v17 = vsel %vm418_vm7, %v414_v14, -1e+09  ;;  %v421_v20 = vsel %vm419_vm10, %v415_v15, -1e+09 }
 0x2bd   :  { %v621_v18 = vpop.f32.mrb[5].mxu0  ;;  %v422_v19 = vsel %vm136_vm1, %v420_v17, -inf  ;;  %v425_v21 = vsel %vm136_vm1, %v421_v20, -inf  ;;  %v627_v40 = vadd.f32 %v1288_v16, %v1656_v37 }
 0x2be   :  { %423 = vmax.xlane.f32.xlu1 %v422_v19  ;;  %v622_v38 = vadd.f32 %v1656_v37, %v621_v18 }
 0x2bf   :  { %v633_v44 = vmin.f32 %v627_v40, 0.0  ;;  %vm631_vm12 = vcmp.gt.f32.partialorder %v627_v40, 0.0 }
 0x2c0   :  { %v632_v39 = vmin.f32 %v622_v38, 0.0  ;;  %vm630_vm11 = vcmp.gt.f32.partialorder %v622_v38, 0.0 }
 0x2c1   :  { %v636_v48 = vmul.f32 1.442695, %v633_v44 }
 0x2c2   :  { %426 = vmax.xlane.f32.xlu1 %v425_v21  ;;  %v634_v41 = vmul.f32 1.442695, %v632_v39 }
 0x34b   :  { %v424_v22 = vpop.xlane.xlu1 %423 }
 0x34c   :  { %v428_v23 = vsub.f32 %v420_v17, %v424_v22 }
 0x34e   :  { %v430_v24 = vmul.f32 1.442695, %v428_v23 }
 0x34f   :  { %v427_v25 = vpop.xlane.xlu1 %426 }
 0x350   :  { %1415 = vpow2.f32 %v430_v24  ;;  %v429_v26 = vsub.f32 %v421_v20, %v427_v25 }
 0x352   :  { %v432_v27 = vmul.f32 1.442695, %v429_v26  ;;  %v1145_v26 = vld [vmem:[%s1726_s6 + $0x6] ss:$0 sm:$0xff] }
 0x354   :  { %1417 = vpow2.f32 %v432_v27 }
 0x355   :  { %1419 = vpow2.f32 %v634_v41 }
 0x35a   :  { %v1416_v28 = vpop.eup %1415 }
 0x35b   :  { %v434_v29 = vsel %vm418_vm7, %v1416_v28, 0.0 }
 0x35c   :  { %v436_v30 = vsel %vm136_vm1, %v434_v29, 0.0 }
 0x35d   :  { %437 = vadd.xlane.f32.xlu0 %v436_v30 }
 0x35e   :  { %v1418_v31 = vpop.eup %1417 }
 0x35f   :  { %v435_v32 = vsel %vm419_vm10, %v1418_v31, 0.0  ;;  %v1420_v49 = vpop.eup %1419 }
 0x360   :  { %v439_v33 = vsel %vm136_vm1, %v435_v32, 0.0  ;;  %v1139_v54 = vadd.f32 -1.0, %v1420_v49 }
 0x361   :  { %440 = vadd.xlane.f32.xlu1 %v439_v33 }
 0x362   :  { %v640_v59 = vsel %vm630_vm11, %v622_v38, %v1139_v54 }
 0x3ea   :  { %v438_v42 = vpop.xlane.xlu0 %437 }
 0x3eb   :  { %v442_v43 = vadd.f32 1e-08, %v438_v42 }
 0x3ed   :  { %1421 = vrcp.f32 %v442_v43 }
 0x3ee   :  { %v441_v45 = vpop.xlane.xlu1 %440 }
 0x3ef   :  { %v443_v46 = vadd.f32 1e-08, %v441_v45 }
 0x3f1   :  { %1423 = vrcp.f32 %v443_v46 }
 0x3f2   :  { %1425 = vpow2.f32 %v636_v48 }
 0x3f7   :  { %v1422_v50 = vpop.eup %1421 }
 0x3f8   :  { %v446_v51 = vmul.f32 %v1422_v50, %v434_v29 }
 0x3fa   :  { %1275 = vmatprep.mubr.msk.f32.mxu1 %vm136_vm1, %v446_v51 }
 0x3fb   :  { %v1424_v55 = vpop.eup %1423 }
 0x3fc   :  { %v447_v56 = vmul.f32 %v1424_v55, %v435_v32  ;;  %v1426_v58 = vpop.eup %1425 }
 0x3fd   :  { %v1140_v60 = vadd.f32 -1.0, %v1426_v58 }
 0x3fe   :  { %1276 = vmatmul.mubr.msk.f32.vlgmr.msra.gmra.mrb[4].mxu1 %vm136_vm1, %v447_v56 }
 0x3ff   :  { %1384 = vmatpush3.bf16.msra.mxu1 %v1381_v36  ;;  %1297 = vmatprep.mubr.msk.f32.mxu1 %vm318_vm3, %v640_v59  ;;  %v641_v61 = vsel %vm631_vm12, %v627_v40, %v1140_v60 }
 0x400   :  { %1386 = vmatprep.subr.bf16.mxu1 %v1385_v57 }
 0x403   :  { %1388 = vmatpush3.bf16.msra.mxu1 %v1385_v57 }
 0x404   :  { %1398 = vmatprep.subr.bf16.mxu1 %v1381_v36 }
 0x406   :  { %1298 = vmatmul.mubr.msk.f32.vlgmr.msra.gmra.mrb[6].mxu1 %vm318_vm3, %v641_v61 }
 0x407   :  { %1400 = vmatpush3.bf16.msra.mxu1 %v1381_v36 }
 0x408   :  { %1402 = vmatprep.subr.bf16.mxu1 %v1385_v57 }
 0x40b   :  { %1404 = vmatpush3.bf16.msra.mxu1 %v1385_v57 }
 0x4d1   :  { %v1277_v62 = vpop.f32.mrb[4].mxu1 }
 0x4d2   :  { %v532_v63 = vmin.f32 %v1277_v62, 0.0  ;;  %v520_v0 = vpop.f32.mrb[5].mxu1  ;;  %vm530_vm14 = vcmp.gt.f32.partialorder %v1277_v62, 0.0 }
 0x4d3   :  { %v531_v1 = vmin.f32 %v520_v0, 0.0  ;;  %vm529_vm13 = vcmp.gt.f32.partialorder %v520_v0, 0.0 }
 0x4d4   :  { %v535_v2 = vmul.f32 1.442695, %v532_v63 }
 0x4d5   :  { %v533_v3 = vmul.f32 1.442695, %v531_v1  ;;  %v1028_v1 = vld [vmem:[%s1723_s3 + $0x8] sm:$0xff] }
 0x4d6   :  { %1427 = vpow2.f32 %v535_v2  ;;  %v1027_v2 = vld [vmem:[%s1723_s3] sm:$0xff] }
 0x4d7   :  { %1429 = vpow2.f32 %v533_v3  ;;  %v1158_v3 = vld [vmem:[%s1723_s3 + $0x10] sm:$0xff]  ;;  %s1486_s3 = smov [#allocation2]  }
 0x4d8   :  { %s1103_s27 = sshll.u32 %s1486_s3, 4  ;;  %s1104_s27 = int_to_ptr.vmem [resolvable:$true] %s1103_s27 }
 0x4d9   :  { %v1299_v4 = vpop.f32.mrb[6].mxu1  ;;  %s1459_s28 = scalar_lea.vmem %s1104_s27, 16  ;;  %s1463_s29 = scalar_lea.vmem %s1104_s27, 32 }
 0x4da   :  { %v723_v5 = vpop.f32.mrb[7].mxu1  ;;  %v729_v28 = vadd.f32 %v1299_v4, %v1145_v26  ;;  %p1460_p0 = scmp.ne.s32.totalorder %s1104_s27, %s1459_s28  ;;  %p1464_p1 = scmp.lt.s32.totalorder %s1104_s27, %s1104_s27 }
 0x4db   :  { %v724_v31 = vadd.f32 %v1145_v26, %v723_v5  ;;  %p1465_p2 = scmp.lt.s32.totalorder %s1463_s29, %s1459_s28 }
 0x4dc   :  { %v907_v36 = vmul.f32 %v729_v28, %v729_v28 }
 0x4dd   :  { %v906_v38 = vmul.f32 %v724_v31, %v724_v31  ;;  %p1466_p3 = por %p1465_p2, %p1464_p1 }
 0x4de   :  { %v911_v39 = vsel %vm318_vm3, %v907_v36, 0.0 }
 0x4df   :  { %v908_v40 = vsel %vm318_vm3, %v906_v38, 0.0  ;;  %p1467_p4 = pnand %p1466_p3, %p1460_p0 }
 0x4e0   :  { %v1428_v6 = vpop.eup %1427 }
 0x4e1   :  { %v1430_v7 = vpop.eup %1429  ;;  %v1135_v8 = vadd.f32 -1.0, %v1428_v6 }
 0x4e2   :  { %v1134_v9 = vadd.f32 -1.0, %v1430_v7 }
 0x4e3   :  { %v540_v11 = vsel %vm530_vm14, %v1277_v62, %v1135_v8 }
 0x4e4   :  { %v539_v10 = vsel %vm529_vm13, %v520_v0, %v1134_v9 }
 0x4e5   :  { %1308 = vmatprep.mubr.msk.f32.mxu0 %vm318_vm3, %v539_v10 }
 0x4e6   :  { %1309 = vmatmul.mubr.msk.f32.vlgmr.msra.gmra.mrb[6].mxu0 %vm318_vm3, %v540_v11 }
 0x5b9   :  { %v1310_v12 = vpop.f32.mrb[6].mxu0 }
 0x5ba   :  { %v810_v13 = vadd.f32 %v1310_v12, %v1656_v37  ;;  %v804_v14 = vpop.f32.mrb[7].mxu0 }
 0x5bb   :  { %v805_v15 = vadd.f32 %v1656_v37, %v804_v14 }
 0x5bc   :  { %v816_v16 = vmin.f32 %v810_v13, 0.0  ;;  %vm814_vm0 = vcmp.gt.f32.partialorder %v810_v13, 0.0 }
 0x5bd   :  { %v815_v17 = vmin.f32 %v805_v15, 0.0  ;;  %vm813_vm15 = vcmp.gt.f32.partialorder %v805_v15, 0.0 }
 0x5be   :  { %v819_v18 = vmul.f32 1.442695, %v816_v16 }
 0x5bf   :  { %v817_v19 = vmul.f32 1.442695, %v815_v17 }
 0x5c0   :  { %1431 = vpow2.f32 %v819_v18 }
 0x5c1   :  { %1433 = vpow2.f32 %v817_v19 }
 0x5ca   :  { %v1432_v20 = vpop.eup %1431 }
 0x5cb   :  { %v1434_v21 = vpop.eup %1433  ;;  %v1151_v22 = vadd.f32 -1.0, %v1432_v20 }
 0x5cc   :  { %v1150_v23 = vadd.f32 -1.0, %v1434_v21 }
 0x5cd   :  { %v824_v25 = vsel %vm814_vm0, %v810_v13, %v1151_v22 }
 0x5ce   :  { %v823_v24 = vsel %vm813_vm15, %v805_v15, %v1150_v23 }
 0x5cf   :  { %1319 = vmatprep.mubr.msk.f32.mxu1 %vm318_vm3, %v823_v24 }
 0x5d0   :  { %1320 = vmatmul.mubr.msk.f32.vlgmr.msra.gmra.mrb[8].mxu1 %vm318_vm3, %v824_v25 }
 0x6a3   :  { %v1321_v27 = vpop.f32.mrb[8].mxu1 }
 0x6a4   :  { %v903_v29 = vadd.f32 %v1321_v27, %v1145_v26  ;;  %v897_v30 = vpop.f32.mrb[9].mxu1 }
 0x6a5   :  { %v898_v32 = vadd.f32 %v1145_v26, %v897_v30 }
 0x6a6   :  { %v921_v33 = vmul.f32 %v903_v29, %v903_v29 }
 0x6a7   :  { %v920_v34 = vmul.f32 %v898_v32, %v898_v32 }
 0x6a8   :  { %v925_v35 = vsel %vm318_vm3, %v921_v33, 0.0 }
 0x6a9   :  { %926 = vadd.xlane.f32.xlu1 %v925_v35  ;;  %v922_v37 = vsel %vm318_vm3, %v920_v34, 0.0 }
 0x6aa   :  { %923 = vadd.xlane.f32.xlu0 %v922_v37 }
 0x6ad   :  { %912 = vadd.xlane.f32.xlu1 %v911_v39 }
 0x6ae   :  { %909 = vadd.xlane.f32.xlu0 %v908_v40 }
 0x736   :  { %v927_v41 = vpop.xlane.xlu1 %926 }
 0x737   :  { %v929_v42 = vadd.f32 1e-08, %v927_v41  ;;  %v924_v43 = vpop.xlane.xlu0 %923 }
 0x738   :  { %v928_v44 = vadd.f32 1e-08, %v924_v43 }
 0x739   :  { %1435 = vrsqrt.f32 %v929_v42 }
 0x73a   :  { %1437 = vrsqrt.f32 %v928_v44  ;;  %v913_v45 = vpop.xlane.xlu1 %912 }
 0x73b   :  { %v910_v46 = vpop.xlane.xlu0 %909  ;;  %v915_v49 = vadd.f32 1e-08, %v913_v45 }
 0x73c   :  { %v914_v48 = vadd.f32 1e-08, %v910_v46 }
 0x73e   :  { %1439 = vrsqrt.f32 %v914_v48 }
 0x73f   :  { %1441 = vrsqrt.f32 %v915_v49 }
 0x743   :  { %v1436_v50 = vpop.eup %1435 }
 0x744   :  { %v1438_v51 = vpop.eup %1437  ;;  %v933_v52 = vmul.f32 %v1436_v50, %v903_v29 }
 0x745   :  { %v932_v53 = vmul.f32 %v1438_v51, %v898_v32 }
 0x747   :  { %v1405_v54 = vpack.c.bf16 %v933_v52, %v932_v53 }
 0x748   :  { %v1440_v55 = vpop.eup %1439 }
 0x749   :  { %1407 = vmatprep.subr.msk.bf16.mxu0 %vm1613_vm4, %v1405_v54  ;;  %v918_v56 = vmul.f32 %v1440_v55, %v724_v31  ;;  %v1442_v57 = vpop.eup %1441 }
 0x74a   :  { %1410 = vmatpush3.bf16.xpose.msk.msra.mxu0 %vm1613_vm4, %v1405_v54  ;;  %v919_v58 = vmul.f32 %v1442_v57, %v729_v28 }
 0x74b   :  { %1326 = vmatprep.mubr.msk.f32.mxu0 %vm318_vm3, %v918_v56 }
 0x751   :  { %1327 = vmatmul.mubr.msk.f32.vlgmr.msra.gmra.mrb[8].mxu0 %vm318_vm3, %v919_v58 }
 0x824   :  { %v1328_v59 = vpop.f32.mrb[8].mxu0 }
 0x825   :  { %v1022_v60 = vmul.f32 1.25, %v1328_v59  ;;  %v1012_v61 = vpop.f32.mrb[9].mxu0 }
 0x826   :  { %v1021_v62 = vmul.f32 1.25, %v1012_v61 }
 0x827   :  { %v1025_v63 = vmul.f32 1.442695, %v1022_v60 }
 0x828   :  { %v1023_v0 = vmul.f32 1.442695, %v1021_v62 }
 0x829   :  { %1443 = vpow2.f32 %v1025_v63 }
 0x82a   :  { %1445 = vpow2.f32 %v1023_v0 }
 0x833   :  { %v1444_v4 = vpop.eup %1443 }
 0x834   :  { %v1446_v5 = vpop.eup %1445  ;;  %v1035_v6 = vsel %vm136_vm1, %v1444_v4, 0.0  ;;  %v1043_v7 = vmul.f32 %v1444_v4, %v1028_v1  ;;  %v1075_v8 = vmul.f32 %v1444_v4, %v1159_v47 }
 0x835   :  { %1036 = vadd.xlane.f32.xlu1 %v1035_v6  ;;  %v1032_v9 = vsel %vm136_vm1, %v1446_v5, 0.0  ;;  %v1042_v10 = vmul.f32 %v1446_v5, %v1027_v2  ;;  %v1074_v11 = vmul.f32 %v1446_v5, %v1158_v3 }
 0x836   :  { %1033 = vadd.xlane.f32.xlu0 %v1032_v9  ;;  %v1065_v12 = vadd.f32 %v1035_v6, %v1032_v9  ;;  %v1077_v13 = vsel %vm136_vm1, %v1075_v8, 0.0  ;;  %v1047_v16 = vsel %vm136_vm1, %v1043_v7, 0.0 }
 0x837   :  { %v1076_v14 = vsel %vm136_vm1, %v1074_v11, 0.0  ;;  %v1044_v18 = vsel %vm136_vm1, %v1042_v10, 0.0 }
 0x838   :  { %v1066_v15 = vrot.slane %v1065_v12, 4  ;;  %v1078_v17 = vadd.f32 %v1077_v13, %v1076_v14 }
 0x839   :  { %1048 = vadd.xlane.f32.xlu1 %v1047_v16 }
 0x83a   :  { %v1067_v19 = vadd.f32 %v1066_v15, %v1065_v12  ;;  %1045 = vadd.xlane.f32.xlu0 %v1044_v18  ;;  %v1079_v20 = vrot.slane %v1078_v17, 4 }
 0x83c   :  { %v1068_v21 = vrot.slane %v1067_v19, 2  ;;  %v1080_v23 = vadd.f32 %v1079_v20, %v1078_v17 }
 0x83e   :  { %v1069_v22 = vadd.f32 %v1068_v21, %v1067_v19  ;;  %v1081_v26 = vrot.slane %v1080_v23, 2 }
 0x840   :  { %v1070_v24 = vrot.slane %v1069_v22, 1  ;;  %v1082_v28 = vadd.f32 %v1081_v26, %v1080_v23 }
 0x842   :  { %v1071_v25 = vadd.f32 %v1070_v24, %v1069_v22  ;;  %v1083_v29 = vrot.slane %v1082_v28, 1 }
 0x844   :  { %v1072_v27 = vadd.f32 1e-08, %v1071_v25  ;;  %v1084_v30 = vadd.f32 %v1083_v29, %v1082_v28 }
 0x846   :  { %1447 = vrcp.f32 %v1072_v27 }
 0x850   :  { %v1448_v31 = vpop.eup %1447 }
 0x851   :  { %v1085_v32 = vmul.f32 %v1448_v31, %v1084_v30 }
 0x853   :  { %1449 = vlog2.f32 %v1085_v32 }
 0x85d   :  { %v1450_v33 = vpop.eup %1449 }
 0x85e   :  { %v1087_v34 = vmul.f32 0.6931472, %v1450_v33 }
 0x860   :  { %v1088_v35 = vsel %vm136_vm1, %v1087_v34, 0.0 }
 0x861   :  { %1089 = vadd.xlane.f32.xlu0 %v1088_v35 }
 0x8c2   :  { %v1037_v36 = vpop.xlane.xlu1 %1036 }
 0x8c3   :  { %v1039_v37 = vadd.f32 1e-08, %v1037_v36  ;;  %v1034_v38 = vpop.xlane.xlu0 %1033 }
 0x8c4   :  { %v1038_v39 = vadd.f32 1e-08, %v1034_v38 }
 0x8c5   :  { %1451 = vrcp.f32 %v1039_v37 }
 0x8c6   :  { %1453 = vrcp.f32 %v1038_v39  ;;  %v1049_v41 = vpop.xlane.xlu1 %1048 }
 0x8c7   :  { %v1046_v44 = vpop.xlane.xlu0 %1045 }
 0x8cf   :  { %v1452_v40 = vpop.eup %1451 }
 0x8d0   :  { %v1454_v42 = vpop.eup %1453  ;;  %v1051_v43 = vmul.f32 %v1452_v40, %v1049_v41 }
 0x8d1   :  { %v1050_v45 = vmul.f32 %v1454_v42, %v1046_v44 }
 0x8d2   :  { %1455 = vlog2.f32 %v1051_v43 }
 0x8d3   :  { %1457 = vlog2.f32 %v1050_v45 }
 0x8dc   :  { %v1456_v46 = vpop.eup %1455 }
 0x8dd   :  { %v1458_v48 = vpop.eup %1457  ;;  %v1055_v49 = vmul.f32 0.6931472, %v1456_v46 }
 0x8de   :  { %v1053_v50 = vmul.f32 0.6931472, %v1458_v48 }
 0x8e0   :  { %v1056_v51 = vadd.f32 %v1055_v49, %v1053_v50 }
 0x8e2   :  { %v1057_v52 = vrot.slane %v1056_v51, 4 }
 0x8e4   :  { %v1058_v53 = vadd.f32 %v1057_v52, %v1056_v51 }
 0x8e6   :  { %v1059_v54 = vrot.slane %v1058_v53, 2 }
 0x8e8   :  { %v1060_v55 = vadd.f32 %v1059_v54, %v1058_v53 }
 0x8ea   :  { %v1061_v56 = vrot.slane %v1060_v55, 1 }
 0x8ec   :  { %v1062_v57 = vadd.f32 %v1061_v56, %v1060_v55 }
 0x8ee   :  { %v1090_v58 = vpop.xlane.xlu0 %1089  ;;  %v1063_v59 = vsub.f32 0.0, %v1062_v57 }
 0x8ef   :  { %v1091_v60 = vsub.f32 0.0, %v1090_v58 }
 0x8f0   :  { %v1064_v61 = vmul.f32 0.0625, %v1063_v59 }
 0x8f1   :  { %v1092_v62 = vmul.f32 0.0625, %v1091_v60 }
 0x8f2   :  { %v1093_v63 = vmul.f32 0.5, %v1064_v61 }
 0x8f3   :  { %v1094_v0 = vmul.f32 0.5, %v1092_v62 }
 0x8f5   :  { %v1095_v1 = vadd.f32 %v1094_v0, %v1093_v63 }
 0x8f7   :  { %1096 = vst [vmem:[#allocation2] sm:$0x1] %v1095_v1 }
 0x8f8   :  { %1470 = shalt.err (!%p1467_p4)
}
 0x8f9   :  { %s1471_s9 = scalar_lea.hbm %s1727_s7, 16 }
 0x8fa   :  { %p1472_p5 = scmp.ne.s32.totalorder %s1727_s7, %s1471_s9  ;;  %p1475_p6 = scmp.lt.u32.totalorder %s1471_s9, %s1727_s7 }
 0x8fc   :  { %p1477_p7 = pnand %p1475_p6, %p1472_p5 }
 0x8fe   :  { %1480 = shalt.err (!%p1477_p7)
}
 0x8ff   :  { %1106 = dma.vmem_to_hbm [thread:$0]  %s1104_s27, 16, %s1727_s7, [#allocation3]  }
 0x900   :  { %1481 = dma.done.wait [#allocation3], 16  }
 0x901   :  { %1482 = vsyncadd [#allocation3], 4294967280 }
 0x902   :  { %1110 = vsyncpa [#allocation3], 1 }

</bundles_post_ra>
